<compile_context>
chip_gen: v6e
topology: v6e:2x2x1
jax: 0.10.0
libtpu: 0.0.40
codegen_flags: <defaults>
</compile_context>

<pallas_src>
import functools
import math

import jax
import jax.numpy as jnp
from jax.experimental import pallas as pl
from jax.experimental.pallas import tpu as pltpu

HIDDEN = 20      # module hard-codes 20-unit hidden layers
LANE = 128       # TPU lane width; hidden dims padded to this
CHUNK = 512      # rows processed per in-kernel sub-step


def _round_up(n, m):
    return ((n + m - 1) // m) * m


def _sigmoid(x):
    # sigmoid(x) == 0.5 * tanh(0.5 * x) + 0.5  -> single EUP op per element.
    return 0.5 * jnp.tanh(0.5 * x) + 0.5


def _mlp_kernel(x_ref, w1_ref, b1_ref, w2_ref, b2_ref, w3_ref, b3_ref, o_ref,
                *, chunk):
    num_chunks = x_ref.shape[0] // chunk  # static

    # Weights / biases are VMEM-resident (constant index_map); load once,
    # reuse across all sub-chunks.
    w1 = w1_ref[...]
    b1 = b1_ref[...]
    w2 = w2_ref[...]
    b2 = b2_ref[...]
    w3 = w3_ref[...]
    b3 = b3_ref[...]

    @pl.loop(0, num_chunks)
    def _(c):
        r = pl.multiple_of(c * chunk, chunk)
        xt = x_ref[pl.ds(r, chunk), :]
        # out_1 = sigmoid(x @ W1 + b1)
        h1 = _sigmoid(
            jnp.dot(xt, w1, preferred_element_type=jnp.float32) + b1)
        # out_2 = sigmoid(out_1 @ W2 + b2)
        h2 = _sigmoid(
            jnp.dot(h1.astype(w2.dtype), w2,
                    preferred_element_type=jnp.float32) + b2)
        # out_3 = out_2 @ W3 + b3  (no activation) -- narrow (out_dim) store.
        o_ref[pl.ds(r, chunk), :] = (
            jnp.dot(h2.astype(w3.dtype), w3,
                    preferred_element_type=jnp.float32) + b3
        ).astype(o_ref.dtype)


def init_params(key, input_dim, output_dim):
    """Deterministic init mimicking nn.Linear default (uniform +/- 1/sqrt(fan_in)).

    Returns the logical (unpadded) params (reference) and TPU-friendly padded
    params (kernel).  Padding is done once here, not per call.
    """
    ks = jax.random.split(key, 6)

    def linear(kw, kb, fan_in, fan_out):
        bound = 1.0 / math.sqrt(fan_in)
        w = jax.random.uniform(kw, (fan_in, fan_out), jnp.float32, -bound, bound)
        b = jax.random.uniform(kb, (1, fan_out), jnp.float32, -bound, bound)
        return w, b

    w1, b1 = linear(ks[0], ks[1], input_dim, HIDDEN)
    w2, b2 = linear(ks[2], ks[3], HIDDEN, HIDDEN)
    w3, b3 = linear(ks[4], ks[5], HIDDEN, output_dim)

    def pad_cols(a, n):
        return jnp.pad(a, ((0, 0), (0, n - a.shape[1])))

    def pad_rows(a, n):
        return jnp.pad(a, ((0, n - a.shape[0]), (0, 0)))

    params = dict(w1=w1, b1=b1, w2=w2, b2=b2, w3=w3, b3=b3)
    # Zero-padded rows/cols guarantee that the dead hidden lanes (which carry
    # sigmoid(0)=0.5) never contribute to live outputs.  W3/b3 keep only the
    # real output columns so the kernel writes a narrow output.
    params_padded = dict(
        w1=pad_cols(w1, LANE),                        # [in, 128]
        b1=pad_cols(b1, LANE),                        # [1, 128]
        w2=pad_cols(pad_rows(w2, LANE), LANE),        # [128, 128]
        b2=pad_cols(b2, LANE),                        # [1, 128]
        w3=pad_rows(w3, LANE),                        # [128, out]
        b3=b3,                                        # [1, out]
    )
    return params, params_padded


def _choose_tiling(B, tile_max):
    """Return (b_padded, tile_b, chunk) with bounded batch-padding waste."""
    b8 = _round_up(B, 8)
    if b8 <= CHUNK:
        return b8, b8, b8
    tile_max = _round_up(max(tile_max, CHUNK), CHUNK)
    num_tiles = -(-b8 // tile_max)                       # ceil
    tile_b = _round_up(-(-b8 // num_tiles), CHUNK)       # per-tile rows
    return num_tiles * tile_b, tile_b, CHUNK


def love_forward(x, params_padded, output_dim, *, tile_b=8192, use_bf16=False):
    """Pallas forward for the 3-layer MLP `love`.

    x: [B, input_dim] float32.
    use_bf16: cast x / weights to bf16 for the MXU dots (accumulate in f32).
    """
    B, in_dim = x.shape
    b_padded, tile_b, chunk = _choose_tiling(B, tile_b)
    if b_padded != B:
        x = jnp.pad(x, ((0, b_padded - B), (0, 0)))

    p = params_padded
    w1, w2, w3 = p["w1"], p["w2"], p["w3"]
    if use_bf16:
        x = x.astype(jnp.bfloat16)
        w1 = w1.astype(jnp.bfloat16)
        w2 = w2.astype(jnp.bfloat16)
        w3 = w3.astype(jnp.bfloat16)

    grid = (b_padded // tile_b,)
    const_spec = lambda arr: pl.BlockSpec(arr.shape, lambda i: (0, 0))

    flops = 2 * b_padded * (in_dim * LANE + LANE * LANE + LANE * output_dim)
    weight_bytes = 4 * (in_dim * LANE + LANE + LANE * LANE + LANE
                        + LANE * output_dim + output_dim)
    bytes_accessed = 4 * b_padded * (in_dim + output_dim) + weight_bytes

    out = pl.pallas_call(
        functools.partial(_mlp_kernel, chunk=chunk),
        out_shape=jax.ShapeDtypeStruct((b_padded, output_dim), jnp.float32),
        grid=grid,
        in_specs=[
            pl.BlockSpec((tile_b, in_dim), lambda i: (i, 0)),   # x tile
            const_spec(w1), const_spec(p["b1"]),
            const_spec(w2), const_spec(p["b2"]),
            const_spec(w3), const_spec(p["b3"]),
        ],
        out_specs=pl.BlockSpec((tile_b, output_dim), lambda i: (i, 0)),
        compiler_params=pltpu.CompilerParams(
            dimension_semantics=("parallel",),
        ),
        cost_estimate=pl.CostEstimate(
            flops=flops,
            transcendentals=2 * b_padded * LANE,   # two activation layers
            bytes_accessed=bytes_accessed,
        ),
    )(x, w1, p["b1"], w2, p["b2"], w3, p["b3"])

    # Only batch padding (if any) remains to slice off; columns are exact.
    return out if b_padded == B else out[:B]


def love_reference(x, p):
    h1 = jax.nn.sigmoid(x @ p["w1"] + p["b1"])
    h2 = jax.nn.sigmoid(h1 @ p["w2"] + p["b2"])
    return h2 @ p["w3"] + p["b3"]


if __name__ == "__main__":
    key = jax.random.PRNGKey(0)
    k_param, k_x = jax.random.split(key)

    input_dim, output_dim, batch = 4, 4, 8
    params, params_padded = init_params(k_param, input_dim, output_dim)

    # Input reminiscent of the script's cardioid curve x = a*(2cos t - cos 2t),
    # tiled into [batch, input_dim] features.
    a = 3.0
    t = jnp.linspace(-math.pi, math.pi, batch * input_dim)
    x_small = (a * (2.0 * jnp.cos(t) - jnp.cos(2.0 * t))).reshape(
        batch, input_dim).astype(jnp.float32)

    # f32 path (exact semantics).
    out = jax.block_until_ready(love_forward(x_small, params_padded, output_dim))
    ref = love_reference(x_small, params)
    assert out.shape == (batch, output_dim)
    assert jnp.allclose(out, ref, atol=1e-4, rtol=1e-4), "f32 mismatch vs reference"

    # Larger batch: exercises batch padding + the in-kernel chunk loop.
    big_b = 1000
    x_big = jax.random.normal(k_x, (big_b, input_dim), jnp.float32)
    out_big = jax.block_until_ready(love_forward(x_big, params_padded, output_dim))
    ref_big = love_reference(x_big, params)
    assert out_big.shape == (big_b, output_dim)
    assert jnp.allclose(out_big, ref_big, atol=1e-4, rtol=1e-4), "batched mismatch"

    # bf16-matmul path: looser numerical expectations, just check it runs sane.
    out_bf16 = jax.block_until_ready(
        love_forward(x_small, params_padded, output_dim, use_bf16=True))
    assert out_bf16.shape == (batch, output_dim)
    assert bool(jnp.all(jnp.isfinite(out_bf16)))

    print("KERNEL_OK")
</pallas_src>

<mosaic_0001>
module attributes {stable_mosaic.version = 11 : i64} {
  func.func @_mlp_kernel(%arg0: i32, %arg1: memref<8x4xf32, #tpu.memory_space<vmem>>, %arg2: memref<4x128xf32, #tpu.memory_space<vmem>>, %arg3: memref<1x128xf32, #tpu.memory_space<vmem>>, %arg4: memref<128x128xf32, #tpu.memory_space<vmem>>, %arg5: memref<1x128xf32, #tpu.memory_space<vmem>>, %arg6: memref<128x4xf32, #tpu.memory_space<vmem>>, %arg7: memref<1x4xf32, #tpu.memory_space<vmem>>, %arg8: memref<8x4xf32, #tpu.memory_space<vmem>>) attributes {dimension_semantics = [#tpu.dimension_semantics<parallel>], iteration_bounds = array<i64: 1>, scalar_prefetch = 0 : i64, scratch_operands = 0 : i64, tpu.core_type = #tpu.core_type<tc>, window_params = [{transform_indices = @transform_0, window_bounds = array<i64: 8, 4>}, {pipeline_mode = #tpu.pipeline_mode<synchronous>, transform_indices = @transform_1, window_bounds = array<i64: 4, 128>}, {pipeline_mode = #tpu.pipeline_mode<synchronous>, transform_indices = @transform_2, window_bounds = array<i64: 1, 128>}, {pipeline_mode = #tpu.pipeline_mode<synchronous>, transform_indices = @transform_3, window_bounds = array<i64: 128, 128>}, {pipeline_mode = #tpu.pipeline_mode<synchronous>, transform_indices = @transform_4, window_bounds = array<i64: 1, 128>}, {pipeline_mode = #tpu.pipeline_mode<synchronous>, transform_indices = @transform_5, window_bounds = array<i64: 128, 4>}, {pipeline_mode = #tpu.pipeline_mode<synchronous>, transform_indices = @transform_6, window_bounds = array<i64: 1, 4>}, {transform_indices = @transform_7, window_bounds = array<i64: 8, 4>}]} {
    %c0 = arith.constant 0 : index
    %c0_0 = arith.constant 0 : index
    %0 = vector.load %arg2[%c0, %c0_0] : memref<4x128xf32, #tpu.memory_space<vmem>>, vector<4x128xf32>
    %c0_1 = arith.constant 0 : index
    %c0_2 = arith.constant 0 : index
    %1 = vector.load %arg3[%c0_1, %c0_2] : memref<1x128xf32, #tpu.memory_space<vmem>>, vector<1x128xf32>
    %c0_3 = arith.constant 0 : index
    %c0_4 = arith.constant 0 : index
    %2 = vector.load %arg4[%c0_3, %c0_4] : memref<128x128xf32, #tpu.memory_space<vmem>>, vector<128x128xf32>
    %c0_5 = arith.constant 0 : index
    %c0_6 = arith.constant 0 : index
    %3 = vector.load %arg5[%c0_5, %c0_6] : memref<1x128xf32, #tpu.memory_space<vmem>>, vector<1x128xf32>
    %c0_7 = arith.constant 0 : index
    %c0_8 = arith.constant 0 : index
    %4 = vector.load %arg6[%c0_7, %c0_8] : memref<128x4xf32, #tpu.memory_space<vmem>>, vector<128x4xf32>
    %c0_9 = arith.constant 0 : index
    %c0_10 = arith.constant 0 : index
    %5 = vector.load %arg7[%c0_9, %c0_10] : memref<1x4xf32, #tpu.memory_space<vmem>>, vector<1x4xf32>
    %c0_i32 = arith.constant 0 : i32
    %c1_i32 = arith.constant 1 : i32
    %6 = arith.muli %c0_i32, %c1_i32 : i32
    %c0_i32_11 = arith.constant 0 : i32
    %7 = arith.addi %c0_i32_11, %6 : i32
    %c8_i32 = arith.constant 8 : i32
    %8 = arith.muli %7, %c8_i32 : i32
    %9 = tpu.assume_multiple %8, 8 : i32
    %10 = arith.index_cast %9 : i32 to index
    %c0_12 = arith.constant 0 : index
    %11 = vector.load %arg1[%10, %c0_12] : memref<8x4xf32, #tpu.memory_space<vmem>>, vector<8x4xf32>
    %cst = arith.constant dense<0.000000e+00> : vector<8x128xf32>
    %12 = tpu.matmul %11, %0, %cst {dimension_numbers = #tpu.dot_dimension_numbers<[1], [0], [0], [1], [0, 0, 1, 1], [], []>} : vector<8x4xf32>, vector<4x128xf32>, vector<8x128xf32> -> vector<8x128xf32>
    %13 = vector.broadcast %1 : vector<1x128xf32> to vector<8x128xf32>
    %14 = arith.addf %12, %13 : vector<8x128xf32>
    %cst_13 = arith.constant 5.000000e-01 : f32
    %15 = vector.broadcast %cst_13 : f32 to vector<8x128xf32>
    %16 = arith.mulf %15, %14 : vector<8x128xf32>
    %17 = math.tanh %16 : vector<8x128xf32>
    %cst_14 = arith.constant 5.000000e-01 : f32
    %18 = vector.broadcast %cst_14 : f32 to vector<8x128xf32>
    %19 = arith.mulf %18, %17 : vector<8x128xf32>
    %cst_15 = arith.constant 5.000000e-01 : f32
    %20 = vector.broadcast %cst_15 : f32 to vector<8x128xf32>
    %21 = arith.addf %19, %20 : vector<8x128xf32>
    %cst_16 = arith.constant dense<0.000000e+00> : vector<8x128xf32>
    %22 = tpu.matmul %21, %2, %cst_16 {dimension_numbers = #tpu.dot_dimension_numbers<[1], [0], [0], [1], [0, 0, 1, 1], [], []>} : vector<8x128xf32>, vector<128x128xf32>, vector<8x128xf32> -> vector<8x128xf32>
    %23 = vector.broadcast %3 : vector<1x128xf32> to vector<8x128xf32>
    %24 = arith.addf %22, %23 : vector<8x128xf32>
    %cst_17 = arith.constant 5.000000e-01 : f32
    %25 = vector.broadcast %cst_17 : f32 to vector<8x128xf32>
    %26 = arith.mulf %25, %24 : vector<8x128xf32>
    %27 = math.tanh %26 : vector<8x128xf32>
    %cst_18 = arith.constant 5.000000e-01 : f32
    %28 = vector.broadcast %cst_18 : f32 to vector<8x128xf32>
    %29 = arith.mulf %28, %27 : vector<8x128xf32>
    %cst_19 = arith.constant 5.000000e-01 : f32
    %30 = vector.broadcast %cst_19 : f32 to vector<8x128xf32>
    %31 = arith.addf %29, %30 : vector<8x128xf32>
    %cst_20 = arith.constant dense<0.000000e+00> : vector<8x4xf32>
    %32 = tpu.matmul %31, %4, %cst_20 {dimension_numbers = #tpu.dot_dimension_numbers<[1], [0], [0], [1], [0, 0, 1, 1], [], []>} : vector<8x128xf32>, vector<128x4xf32>, vector<8x4xf32> -> vector<8x4xf32>
    %33 = vector.broadcast %5 : vector<1x4xf32> to vector<8x4xf32>
    %34 = arith.addf %32, %33 : vector<8x4xf32>
    %35 = arith.index_cast %9 : i32 to index
    %c0_21 = arith.constant 0 : index
    %36 = vector.load %arg8[%35, %c0_21] : memref<8x4xf32, #tpu.memory_space<vmem>>, vector<8x4xf32>
    tpu.vector_store %arg8[%35, %c0_21], %34 {strides = array<i32>} : memref<8x4xf32, #tpu.memory_space<vmem>>, vector<8x4xf32>,
    %c1_i32_22 = arith.constant 1 : i32
    return
  }
  func.func @transform_0(%arg0: i32) -> (i32, i32) {
    %c0_i32 = arith.constant 0 : i32
    %c0_i32_0 = arith.constant 0 : i32
    return %arg0, %c0_i32 : i32, i32
  }
  func.func @transform_1(%arg0: i32) -> (i32, i32) {
    %c0_i32 = arith.constant 0 : i32
    %c0_i32_0 = arith.constant 0 : i32
    %c0_i32_1 = arith.constant 0 : i32
    return %c0_i32, %c0_i32_0 : i32, i32
  }
  func.func @transform_2(%arg0: i32) -> (i32, i32) {
    %c0_i32 = arith.constant 0 : i32
    %c0_i32_0 = arith.constant 0 : i32
    %c0_i32_1 = arith.constant 0 : i32
    return %c0_i32, %c0_i32_0 : i32, i32
  }
  func.func @transform_3(%arg0: i32) -> (i32, i32) {
    %c0_i32 = arith.constant 0 : i32
    %c0_i32_0 = arith.constant 0 : i32
    %c0_i32_1 = arith.constant 0 : i32
    return %c0_i32, %c0_i32_0 : i32, i32
  }
  func.func @transform_4(%arg0: i32) -> (i32, i32) {
    %c0_i32 = arith.constant 0 : i32
    %c0_i32_0 = arith.constant 0 : i32
    %c0_i32_1 = arith.constant 0 : i32
    return %c0_i32, %c0_i32_0 : i32, i32
  }
  func.func @transform_5(%arg0: i32) -> (i32, i32) {
    %c0_i32 = arith.constant 0 : i32
    %c0_i32_0 = arith.constant 0 : i32
    %c0_i32_1 = arith.constant 0 : i32
    return %c0_i32, %c0_i32_0 : i32, i32
  }
  func.func @transform_6(%arg0: i32) -> (i32, i32) {
    %c0_i32 = arith.constant 0 : i32
    %c0_i32_0 = arith.constant 0 : i32
    %c0_i32_1 = arith.constant 0 : i32
    return %c0_i32, %c0_i32_0 : i32, i32
  }
  func.func @transform_7(%arg0: i32) -> (i32, i32) {
    %c0_i32 = arith.constant 0 : i32
    %c0_i32_0 = arith.constant 0 : i32
    return %arg0, %c0_i32 : i32, i32
  }
}

</mosaic_0001>

<bundles_post_ra>
// kernel: tpu_custom_call.1
= control target key start
LH: loop header
LB: loop body
LE: loop exit
PB: predicated region body
PF: predicated region fallthrough
CT: control target
= control target key end

     0   :  { %vm73_vm0 = vcmask 1043456   ;;  %vm69_vm1 = vcmask 31744   ;;  %v434_v0 = vmov 0.0   ;;  %vm435_vm2 = vmmov 0   ;;  %s631_s1 = inlined_call_operand.vmem [shape: f32[4,128], index: 1, kind: input, shape index: {}]   ;;  %s632_s0 = inlined_call_operand.vmem [shape: f32[8,4], index: 0, kind: input, shape index: {}]   ;;  %s633_s3 = inlined_call_operand.vmem [shape: f32[128,128], index: 3, kind: input, shape index: {}]   ;;  %s634_s5 = inlined_call_operand.vmem [shape: f32[128,4], index: 5, kind: input, shape index: {}]   ;;  %s635_s2 = inlined_call_operand.vmem [shape: f32[1,128], index: 2, kind: input, shape index: {}]   ;;  %s636_s4 = inlined_call_operand.vmem [shape: f32[1,128], index: 4, kind: input, shape index: {}]   ;;  %s637_s6 = inlined_call_operand.vmem [shape: f32[1,4], index: 6, kind: input, shape index: {}]   ;;  %s638_s7 = inlined_call_operand.vmem [shape: f32[8,4], index: 7, kind: output, shape index: {}]  }
   0x1   :  { %353 = vmatprep.subr.mxu0 %v434_v0  ;;  %v26_v1 = vld [vmem:[%s631_s1] sm:$0xf]  ;;  %355 = vmatprep.mubr.msk.f32.mxu0 %vm435_vm2, %v434_v0  ;;  %v43_v3 = vld [vmem:[%s633_s3 + $0x78] sm:$0xff]  ;;  %v42_v4 = vld [vmem:[%s633_s3 + $0x70] sm:$0xff] }
   0x2   :  { %v62_v2 = vld [vmem:[%s632_s0] sm:$0xff]  ;;  %354 = vmatpush3.msk.msra.mxu0 %vm73_vm0, %v26_v1  ;;  %358 = vmatprep.subr.mxu1 %v434_v0  ;;  %v41_v5 = vld [vmem:[%s633_s3 + $0x68] sm:$0xff]  ;;  %v39_v7 = vld [vmem:[%s633_s3 + $0x58] sm:$0xff] }
   0x3   :  { %356 = vmatmul.mubr.msk.f32.vlgmr.msra.gmra.mxu0 %vm69_vm1, %v62_v2  ;;  %359 = vmatpush3.msra.mxu1 %v43_v3  ;;  %v40_v6 = vld [vmem:[%s633_s3 + $0x60] sm:$0xff]  ;;  %v38_v8 = vld [vmem:[%s633_s3 + $0x50] sm:$0xff]  ;;  %v37_v9 = vld [vmem:[%s633_s3 + $0x48] sm:$0xff] }
   0x4   :  { %360 = vmatprep.subr.mxu1 %v434_v0  ;;  %390 = vmatprep.mubr.msk.f32.mxu1 %vm435_vm2, %v434_v0  ;;  %v36_v10 = vld [vmem:[%s633_s3 + $0x40] sm:$0xff]  ;;  %v35_v11 = vld [vmem:[%s633_s3 + $0x38] sm:$0xff]  ;;  %v34_v12 = vld [vmem:[%s633_s3 + $0x30] sm:$0xff] }
   0x5   :  { %361 = vmatpush3.msra.mxu1 %v42_v4  ;;  %393 = vmatprep.subr.mxu0 %v434_v0  ;;  %v33_v13 = vld [vmem:[%s633_s3 + $0x28] sm:$0xff]  ;;  %v32_v14 = vld [vmem:[%s633_s3 + $0x20] sm:$0xff]  ;;  %v31_v15 = vld [vmem:[%s633_s3 + $0x18] sm:$0xff] }
   0x6   :  { %362 = vmatprep.subr.mxu1 %v434_v0  ;;  %425 = vmatprep.mubr.msk.f32.mxu0 %vm435_vm2, %v434_v0  ;;  %v30_v16 = vld [vmem:[%s633_s3 + $0x10] sm:$0xff]  ;;  %v29_v17 = vld [vmem:[%s633_s3 + $0x8] sm:$0xff]  ;;  %v28_v18 = vld [vmem:[%s633_s3] sm:$0xff] }
   0x7   :  { %363 = vmatpush3.msra.mxu1 %v41_v5  ;;  %v60_v19 = vld [vmem:[%s634_s5 + $0x78] sm:$0xff]  ;;  %v59_v20 = vld [vmem:[%s634_s5 + $0x70] sm:$0xff]  ;;  %v58_v21 = vld [vmem:[%s634_s5 + $0x68] sm:$0xff] }
   0x8   :  { %364 = vmatprep.subr.mxu1 %v434_v0  ;;  %394 = vmatpush3.msra.mxu0 %v60_v19  ;;  %v57_v22 = vld [vmem:[%s634_s5 + $0x60] sm:$0xff]  ;;  %v56_v31 = vld [vmem:[%s634_s5 + $0x58] sm:$0xff]  ;;  %v55_v32 = vld [vmem:[%s634_s5 + $0x50] sm:$0xff] }
   0x9   :  { %365 = vmatpush3.msra.mxu1 %v40_v6  ;;  %395 = vmatprep.subr.mxu0 %v434_v0  ;;  %v312_v23 = vld [vmem:[%s635_s2] ss:$0 sm:$0xff]  ;;  %v54_v33 = vld [vmem:[%s634_s5 + $0x48] sm:$0xff]  ;;  %v52_v35 = vld [vmem:[%s634_s5 + $0x38] sm:$0xff] }
   0xa   :  { %366 = vmatprep.subr.mxu1 %v434_v0  ;;  %396 = vmatpush3.msra.mxu0 %v59_v20  ;;  %v53_v34 = vld [vmem:[%s634_s5 + $0x40] sm:$0xff]  ;;  %v51_v36 = vld [vmem:[%s634_s5 + $0x30] sm:$0xff]  ;;  %v50_v37 = vld [vmem:[%s634_s5 + $0x28] sm:$0xff] }
   0xb   :  { %367 = vmatpush3.msra.mxu1 %v39_v7  ;;  %397 = vmatprep.subr.mxu0 %v434_v0  ;;  %v49_v38 = vld [vmem:[%s634_s5 + $0x20] sm:$0xff]  ;;  %v48_v39 = vld [vmem:[%s634_s5 + $0x18] sm:$0xff]  ;;  %v47_v40 = vld [vmem:[%s634_s5 + $0x10] sm:$0xff] }
   0xc   :  { %368 = vmatprep.subr.mxu1 %v434_v0  ;;  %398 = vmatpush3.msra.mxu0 %v58_v21  ;;  %v46_v41 = vld [vmem:[%s634_s5 + $0x8] sm:$0xff]  ;;  %v45_v42 = vld [vmem:[%s634_s5] sm:$0xff] }
   0xd   :  { %369 = vmatpush3.msra.mxu1 %v38_v8  ;;  %399 = vmatprep.subr.mxu0 %v434_v0  ;;  %v315_v43 = vld [vmem:[%s636_s4] ss:$0 sm:$0xff] }
   0xe   :  { %370 = vmatprep.subr.mxu1 %v434_v0  ;;  %400 = vmatpush3.msra.mxu0 %v57_v22  ;;  %v316_v51 = vld [vmem:[%s637_s6] ss:$0 sm:$0xff] }
   0xf   :  { %371 = vmatpush3.msra.mxu1 %v37_v9  ;;  %401 = vmatprep.subr.mxu0 %v434_v0 }
  0x10   :  { %372 = vmatprep.subr.mxu1 %v434_v0  ;;  %402 = vmatpush3.msra.mxu0 %v56_v31 }
  0x11   :  { %373 = vmatpush3.msra.mxu1 %v36_v10  ;;  %403 = vmatprep.subr.mxu0 %v434_v0 }
  0x12   :  { %374 = vmatprep.subr.mxu1 %v434_v0  ;;  %404 = vmatpush3.msra.mxu0 %v55_v32 }
  0x13   :  { %375 = vmatpush3.msra.mxu1 %v35_v11  ;;  %405 = vmatprep.subr.mxu0 %v434_v0 }
  0x14   :  { %376 = vmatprep.subr.mxu1 %v434_v0  ;;  %406 = vmatpush3.msra.mxu0 %v54_v33 }
  0x15   :  { %377 = vmatpush3.msra.mxu1 %v34_v12  ;;  %407 = vmatprep.subr.mxu0 %v434_v0 }
  0x16   :  { %378 = vmatprep.subr.mxu1 %v434_v0  ;;  %408 = vmatpush3.msra.mxu0 %v53_v34 }
  0x17   :  { %379 = vmatpush3.msra.mxu1 %v33_v13  ;;  %409 = vmatprep.subr.mxu0 %v434_v0 }
  0x18   :  { %380 = vmatprep.subr.mxu1 %v434_v0  ;;  %410 = vmatpush3.msra.mxu0 %v52_v35 }
  0x19   :  { %381 = vmatpush3.msra.mxu1 %v32_v14  ;;  %411 = vmatprep.subr.mxu0 %v434_v0 }
  0x1a   :  { %382 = vmatprep.subr.mxu1 %v434_v0  ;;  %412 = vmatpush3.msra.mxu0 %v51_v36 }
  0x1b   :  { %383 = vmatpush3.msra.mxu1 %v31_v15  ;;  %413 = vmatprep.subr.mxu0 %v434_v0 }
  0x1c   :  { %384 = vmatprep.subr.mxu1 %v434_v0  ;;  %414 = vmatpush3.msra.mxu0 %v50_v37 }
  0x1d   :  { %385 = vmatpush3.msra.mxu1 %v30_v16  ;;  %415 = vmatprep.subr.mxu0 %v434_v0 }
  0x1e   :  { %386 = vmatprep.subr.mxu1 %v434_v0  ;;  %416 = vmatpush3.msra.mxu0 %v49_v38 }
  0x1f   :  { %387 = vmatpush3.msra.mxu1 %v29_v17  ;;  %417 = vmatprep.subr.mxu0 %v434_v0 }
  0x20   :  { %388 = vmatprep.subr.mxu1 %v434_v0  ;;  %418 = vmatpush3.msra.mxu0 %v48_v39 }
  0x21   :  { %389 = vmatpush3.msra.mxu1 %v28_v18  ;;  %419 = vmatprep.subr.mxu0 %v434_v0 }
  0x22   :  { %420 = vmatpush3.msra.mxu0 %v47_v40 }
  0x23   :  { %421 = vmatprep.subr.mxu0 %v434_v0 }
  0x24   :  { %422 = vmatpush3.msra.mxu0 %v46_v41 }
  0x25   :  { %423 = vmatprep.subr.mxu0 %v434_v0 }
  0x26   :  { %424 = vmatpush3.msra.mxu0 %v45_v42 }
  0xc3   :  { %v143_v24 = vpop.f32.mrf.mxu0 }
  0xc4   :  { %v144_v25 = vadd.f32 %v312_v23, %v143_v24 }
  0xc5   :  { %v357_v26 = vpop.f32.mrf.mxu0 }
  0xc6   :  { %v147_v27 = vmul.f32 0.5, %v144_v25 }
  0xc8   :  { %430 = vtanh.f32 %v147_v27 }
  0xd5   :  { %v431_v28 = vpop.eup %430 }
  0xd6   :  { %v149_v29 = vmul.f32 0.5, %v431_v28 }
  0xd8   :  { %v150_v30 = vadd.f32 0.5, %v149_v29 }
  0xda   :  { %391 = vmatmul.mubr.f32.vlgmr.msra.gmra.mxu1 %v150_v30 }
 0x19a   :  { %v223_v44 = vpop.f32.mrf.mxu1 }
 0x19b   :  { %v224_v45 = vadd.f32 %v315_v43, %v223_v44 }
 0x19c   :  { %v392_v46 = vpop.f32.mrf.mxu1 }
 0x19d   :  { %v227_v47 = vmul.f32 0.5, %v224_v45 }
 0x19f   :  { %432 = vtanh.f32 %v227_v47 }
 0x1ac   :  { %v433_v48 = vpop.eup %432 }
 0x1ad   :  { %v229_v49 = vmul.f32 0.5, %v433_v48 }
 0x1af   :  { %v230_v50 = vadd.f32 0.5, %v229_v49 }
 0x1b1   :  { %426 = vmatmul.mubr.f32.vlgmr.msra.gmra.mxu0 %v230_v50 }
 0x271   :  { %v303_v52 = vpop.f32.mrf.mxu0 }
 0x272   :  { %v304_v53 = vadd.f32 %v316_v51, %v303_v52 }
 0x273   :  { %v427_v54 = vpop.f32.mrf.mxu0 }
 0x274   :  { %307 = vst.msk [vmem:[%s638_s7] sm:$0xff] %vm69_vm1, %v304_v53 }

</bundles_post_ra>
